<compile_context>
chip_gen: v5e
topology: v5e:2x2
jax: 0.10.0
libtpu: 0.0.40
codegen_flags: <defaults>
</compile_context>

<pallas_src>
import functools

import jax
import jax.numpy as jnp
from jax import lax
from jax.experimental import pallas as pl
from jax.experimental.pallas import tpu as pltpu


def _gat_subnet_kernel(x_ref, wh_ref, bh_ref, wo_ref, bo_ref, g_ref, o_ref, *,
                       batch: int, n_nodes: int, n_heads: int, hid_c: int):
    # x_ref : [B*N, C]        wh_ref: [C, nH*D]   bh_ref: [1, nH*D]
    # wo_ref: [nH*D, out_c]   bo_ref: [1, out_c]  g_ref : [N, N]
    # o_ref : [B*N, out_c]
    g = g_ref[...]                                    # [N, N]  f32
    wh = wh_ref[...]                                  # [C, nH*D]
    bh = bh_ref[...]                                  # [1, nH*D]
    wo = wo_ref[...]                                  # [nH*D, out_c]
    bo = bo_ref[...]                                  # [1, out_c]

    # Head projections for all batches & heads in one lane-wide MXU matmul.
    h_all = jnp.dot(x_ref[...], wh, preferred_element_type=jnp.float32)  # [B*N, nH*D]

    def attend(h, bias):
        # scores = (h h^T) * graph ; contract last dims directly (MXU handles the
        # transposed operand -> no XLU transpose materialized).
        s = lax.dot_general(h, h, (((1,), (1,)), ((), ())),
                            preferred_element_type=jnp.float32) * g      # [N, N]
        # masked_fill(scores == 0, -1e16)  (faithful to the PyTorch reference)
        s = jnp.where(s == 0.0, jnp.float32(-1e16), s)
        m = jnp.max(s, axis=-1, keepdims=True)
        e = jnp.exp(s - m)
        attn = e * pl.reciprocal(jnp.sum(e, axis=-1, keepdims=True), approx=True)
        return jnp.dot(attn, h, preferred_element_type=jnp.float32) + bias

    def leaky(v):  # LeakyReLU, default negative_slope=0.01
        return jnp.where(v >= 0.0, v, jnp.float32(0.01) * v)

    for b in range(batch):                            # static unroll; B is tiny
        h_b = h_all[b * n_nodes:(b + 1) * n_nodes, :]                    # [N, nH*D]
        head_outs = []
        for hd in range(n_heads):                     # static unroll over heads
            h_hd = h_b[:, hd * hid_c:(hd + 1) * hid_c]                   # [N, D]
            b_hd = bh[:, hd * hid_c:(hd + 1) * hid_c]                    # [1, D]
            head_outs.append(leaky(attend(h_hd, b_hd)))
        hidden = jnp.concatenate(head_outs, axis=-1)                     # [N, nH*D]
        h_out = jnp.dot(hidden, wo, preferred_element_type=jnp.float32)  # [N, out_c]
        out = leaky(attend(h_out, bo))                                   # [N, out_c]
        o_ref[b * n_nodes:(b + 1) * n_nodes, :] = out.astype(o_ref.dtype)


def gat_subnet(params, inputs, graph, *, n_heads: int, hid_c: int):
    """Fused GATSubNet. inputs: [B, N, in_c], graph: [N, N] -> [B, N, out_c]."""
    B, N, C = inputs.shape
    w_heads = params["w_heads"]                       # [C, nH*D]
    b_heads = params["b_heads"]                       # [nH*D]
    w_out = params["w_out"]                           # [nH*D, out_c]
    b_out = params["b_out"]                           # [out_c]
    HD = w_heads.shape[1]
    out_c = w_out.shape[1]

    x_flat = inputs.reshape(B * N, C)                 # fold batch into sublanes
    bh2 = b_heads.reshape(1, HD)
    bo2 = b_out.reshape(1, out_c)

    kernel = functools.partial(_gat_subnet_kernel, batch=B, n_nodes=N,
                               n_heads=n_heads, hid_c=hid_c)
    out_flat = pl.pallas_call(
        kernel,
        out_shape=jax.ShapeDtypeStruct((B * N, out_c), jnp.float32),
        grid=(1,),                                    # single fused invocation
        in_specs=[
            pl.BlockSpec((B * N, C), lambda i: (0, 0)),
            pl.BlockSpec((C, HD), lambda i: (0, 0)),
            pl.BlockSpec((1, HD), lambda i: (0, 0)),
            pl.BlockSpec((HD, out_c), lambda i: (0, 0)),
            pl.BlockSpec((1, out_c), lambda i: (0, 0)),
            pl.BlockSpec((N, N), lambda i: (0, 0)),
        ],
        out_specs=pl.BlockSpec((B * N, out_c), lambda i: (0, 0)),
        compiler_params=pltpu.CompilerParams(
            dimension_semantics=("arbitrary",)),
    )(x_flat, w_heads, bh2, w_out, bo2, graph)
    return out_flat.reshape(B, N, out_c)


def init_gat_params(key, in_c, hid_c, out_c, n_heads):
    """normal(0,1) init on every W.weight and b (matches nn.init.normal_), then
    stacks the head weights/biases so the kernel does one wide matmul per layer."""
    head_wts, head_bs = [], []
    for _ in range(n_heads):
        key, k_w, k_b = jax.random.split(key, 3)
        w = jax.random.normal(k_w, (hid_c, in_c), dtype=jnp.float32)   # Linear weight [out, in]
        b = jax.random.normal(k_b, (hid_c,), dtype=jnp.float32)
        head_wts.append(w.T)                                           # [in_c, hid_c]
        head_bs.append(b)
    key, k_w, k_b = jax.random.split(key, 3)
    w_out = jax.random.normal(k_w, (out_c, hid_c * n_heads), dtype=jnp.float32)
    b_out = jax.random.normal(k_b, (out_c,), dtype=jnp.float32)
    return {
        "w_heads": jnp.concatenate(head_wts, axis=1),                  # [in_c, nH*hid_c]
        "b_heads": jnp.concatenate(head_bs, axis=0),                   # [nH*hid_c]
        "w_out": w_out.T,                                              # [nH*hid_c, out_c]
        "b_out": b_out,                                                # [out_c]
    }


def gat_net_forward(params, data, *, n_heads: int, hid_c: int):
    """Equivalent of GATNet.forward. data = {'graph': [K,N,N], 'flow_x': [B,N,T,F]}."""
    graph = data["graph"][0]                                           # [N, N]
    flow = data["flow_x"]
    B, N = flow.shape[0], flow.shape[1]
    flow = flow.reshape(B, N, -1)                                      # [B, N, in_c]
    prediction = gat_subnet(params, flow, graph, n_heads=n_heads, hid_c=hid_c)
    return prediction[:, :, None, :]                                   # unsqueeze(2)


if __name__ == "__main__":
    # Small shapes: B=2, N=16 nodes, history T=4, features F=2 -> in_c = 8
    B, N, T, Fdim = 2, 16, 4, 2
    in_c = T * Fdim
    hid_c, out_c, n_heads = 16, 8, 2

    key = jax.random.PRNGKey(0)
    key, k_flow, k_graph, k_params = jax.random.split(key, 4)

    flow_x = jax.random.normal(k_flow, (B, N, T, Fdim), dtype=jnp.float32)

    # Random 0/1 adjacency with self-loops.
    adj = (jax.random.uniform(k_graph, (N, N)) > 0.5).astype(jnp.float32)
    adj = jnp.maximum(adj, jnp.eye(N, dtype=jnp.float32))
    graph_batched = adj[None]                                          # data['graph'] = [K, N, N]

    params = init_gat_params(k_params, in_c, hid_c, out_c, n_heads)
    data = {"graph": graph_batched, "flow_x": flow_x}

    pred = gat_net_forward(params, data, n_heads=n_heads, hid_c=hid_c)
    jax.block_until_ready(pred)
    assert pred.shape == (B, N, 1, out_c), pred.shape
    print("KERNEL_OK")
</pallas_src>

<mosaic_0001>
module attributes {stable_mosaic.version = 11 : i64} {
  func.func @_gat_subnet_kernel(%arg0: i32, %arg1: memref<32x8xf32, #tpu.memory_space<vmem>>, %arg2: memref<8x32xf32, #tpu.memory_space<vmem>>, %arg3: memref<1x32xf32, #tpu.memory_space<vmem>>, %arg4: memref<32x8xf32, #tpu.memory_space<vmem>>, %arg5: memref<1x8xf32, #tpu.memory_space<vmem>>, %arg6: memref<16x16xf32, #tpu.memory_space<vmem>>, %arg7: memref<32x8xf32, #tpu.memory_space<vmem>>) attributes {dimension_semantics = [#tpu.dimension_semantics<arbitrary>], iteration_bounds = array<i64: 1>, scalar_prefetch = 0 : i64, scratch_operands = 0 : i64, tpu.core_type = #tpu.core_type<tc>, window_params = [{pipeline_mode = #tpu.pipeline_mode<synchronous>, transform_indices = @transform_0, window_bounds = array<i64: 32, 8>}, {pipeline_mode = #tpu.pipeline_mode<synchronous>, transform_indices = @transform_1, window_bounds = array<i64: 8, 32>}, {pipeline_mode = #tpu.pipeline_mode<synchronous>, transform_indices = @transform_2, window_bounds = array<i64: 1, 32>}, {pipeline_mode = #tpu.pipeline_mode<synchronous>, transform_indices = @transform_3, window_bounds = array<i64: 32, 8>}, {pipeline_mode = #tpu.pipeline_mode<synchronous>, transform_indices = @transform_4, window_bounds = array<i64: 1, 8>}, {pipeline_mode = #tpu.pipeline_mode<synchronous>, transform_indices = @transform_5, window_bounds = array<i64: 16, 16>}, {pipeline_mode = #tpu.pipeline_mode<synchronous>, transform_indices = @transform_6, window_bounds = array<i64: 32, 8>}]} {
    %c0 = arith.constant 0 : index
    %c0_0 = arith.constant 0 : index
    %0 = vector.load %arg6[%c0, %c0_0] : memref<16x16xf32, #tpu.memory_space<vmem>>, vector<16x16xf32>
    %c0_1 = arith.constant 0 : index
    %c0_2 = arith.constant 0 : index
    %1 = vector.load %arg2[%c0_1, %c0_2] : memref<8x32xf32, #tpu.memory_space<vmem>>, vector<8x32xf32>
    %c0_3 = arith.constant 0 : index
    %c0_4 = arith.constant 0 : index
    %2 = vector.load %arg3[%c0_3, %c0_4] : memref<1x32xf32, #tpu.memory_space<vmem>>, vector<1x32xf32>
    %c0_5 = arith.constant 0 : index
    %c0_6 = arith.constant 0 : index
    %3 = vector.load %arg4[%c0_5, %c0_6] : memref<32x8xf32, #tpu.memory_space<vmem>>, vector<32x8xf32>
    %c0_7 = arith.constant 0 : index
    %c0_8 = arith.constant 0 : index
    %4 = vector.load %arg5[%c0_7, %c0_8] : memref<1x8xf32, #tpu.memory_space<vmem>>, vector<1x8xf32>
    %c0_9 = arith.constant 0 : index
    %c0_10 = arith.constant 0 : index
    %5 = vector.load %arg1[%c0_9, %c0_10] : memref<32x8xf32, #tpu.memory_space<vmem>>, vector<32x8xf32>
    %cst = arith.constant dense<0.000000e+00> : vector<32x32xf32>
    %6 = tpu.matmul %5, %1, %cst {dimension_numbers = #tpu.dot_dimension_numbers<[1], [0], [0], [1], [0, 0, 1, 1], [], []>} : vector<32x8xf32>, vector<8x32xf32>, vector<32x32xf32> -> vector<32x32xf32>
    %7 = vector.extract_strided_slice %6 {offsets = [0, 0], sizes = [16, 32], strides = [1, 1]} : vector<32x32xf32> to vector<16x32xf32>
    %8 = vector.extract_strided_slice %7 {offsets = [0, 0], sizes = [16, 16], strides = [1, 1]} : vector<16x32xf32> to vector<16x16xf32>
    %9 = vector.extract_strided_slice %2 {offsets = [0, 0], sizes = [1, 16], strides = [1, 1]} : vector<1x32xf32> to vector<1x16xf32>
    %cst_11 = arith.constant dense<0.000000e+00> : vector<16x16xf32>
    %10 = tpu.matmul %8, %8, %cst_11 {dimension_numbers = #tpu.dot_dimension_numbers<[1], [1], [0], [0], [0, 0, 1, 0], [], []>} : vector<16x16xf32>, vector<16x16xf32>, vector<16x16xf32> -> vector<16x16xf32>
    %11 = arith.mulf %10, %0 : vector<16x16xf32>
    %cst_12 = arith.constant 0.000000e+00 : f32
    %12 = vector.broadcast %cst_12 : f32 to vector<16x16xf32>
    %13 = arith.cmpf oeq, %11, %12 : vector<16x16xf32>
    %cst_13 = arith.constant -1.000000e+16 : f32
    %14 = vector.broadcast %cst_13 : f32 to vector<16x16xf32>
    %15 = arith.select %13, %14, %11 : vector<16x16xi1>, vector<16x16xf32>
    %cst_14 = arith.constant dense<0xFF800000> : vector<16xf32>
    %16 = vector.multi_reduction <maximumf>, %15, %cst_14 [1] : vector<16x16xf32> to vector<16xf32>
    %17 = vector.shape_cast %16 : vector<16xf32> to vector<16x1xf32>
    %18 = vector.broadcast %17 : vector<16x1xf32> to vector<16x16xf32>
    %19 = arith.subf %15, %18 : vector<16x16xf32>
    %20 = math.exp %19 : vector<16x16xf32>
    %cst_15 = arith.constant dense<0.000000e+00> : vector<16xf32>
    %21 = vector.multi_reduction <add>, %20, %cst_15 [1] : vector<16x16xf32> to vector<16xf32>
    %22 = vector.shape_cast %21 : vector<16xf32> to vector<16x1xf32>
    %23 = tpu.reciprocal %22 {approx = true} : vector<16x1xf32> -> vector<16x1xf32>
    %24 = vector.broadcast %23 : vector<16x1xf32> to vector<16x16xf32>
    %25 = arith.mulf %20, %24 : vector<16x16xf32>
    %cst_16 = arith.constant dense<0.000000e+00> : vector<16x16xf32>
    %26 = tpu.matmul %25, %8, %cst_16 {dimension_numbers = #tpu.dot_dimension_numbers<[1], [0], [0], [1], [0, 0, 1, 1], [], []>} : vector<16x16xf32>, vector<16x16xf32>, vector<16x16xf32> -> vector<16x16xf32>
    %27 = vector.broadcast %9 : vector<1x16xf32> to vector<16x16xf32>
    %28 = arith.addf %26, %27 : vector<16x16xf32>
    %cst_17 = arith.constant 0.000000e+00 : f32
    %29 = vector.broadcast %cst_17 : f32 to vector<16x16xf32>
    %30 = arith.cmpf oge, %28, %29 : vector<16x16xf32>
    %cst_18 = arith.constant 0.00999999977 : f32
    %31 = vector.broadcast %cst_18 : f32 to vector<16x16xf32>
    %32 = arith.mulf %31, %28 : vector<16x16xf32>
    %33 = arith.select %30, %28, %32 : vector<16x16xi1>, vector<16x16xf32>
    %34 = vector.extract_strided_slice %7 {offsets = [0, 16], sizes = [16, 16], strides = [1, 1]} : vector<16x32xf32> to vector<16x16xf32>
    %35 = vector.extract_strided_slice %2 {offsets = [0, 16], sizes = [1, 16], strides = [1, 1]} : vector<1x32xf32> to vector<1x16xf32>
    %cst_19 = arith.constant dense<0.000000e+00> : vector<16x16xf32>
    %36 = tpu.matmul %34, %34, %cst_19 {dimension_numbers = #tpu.dot_dimension_numbers<[1], [1], [0], [0], [0, 0, 1, 0], [], []>} : vector<16x16xf32>, vector<16x16xf32>, vector<16x16xf32> -> vector<16x16xf32>
    %37 = arith.mulf %36, %0 : vector<16x16xf32>
    %cst_20 = arith.constant 0.000000e+00 : f32
    %38 = vector.broadcast %cst_20 : f32 to vector<16x16xf32>
    %39 = arith.cmpf oeq, %37, %38 : vector<16x16xf32>
    %cst_21 = arith.constant -1.000000e+16 : f32
    %40 = vector.broadcast %cst_21 : f32 to vector<16x16xf32>
    %41 = arith.select %39, %40, %37 : vector<16x16xi1>, vector<16x16xf32>
    %cst_22 = arith.constant dense<0xFF800000> : vector<16xf32>
    %42 = vector.multi_reduction <maximumf>, %41, %cst_22 [1] : vector<16x16xf32> to vector<16xf32>
    %43 = vector.shape_cast %42 : vector<16xf32> to vector<16x1xf32>
    %44 = vector.broadcast %43 : vector<16x1xf32> to vector<16x16xf32>
    %45 = arith.subf %41, %44 : vector<16x16xf32>
    %46 = math.exp %45 : vector<16x16xf32>
    %cst_23 = arith.constant dense<0.000000e+00> : vector<16xf32>
    %47 = vector.multi_reduction <add>, %46, %cst_23 [1] : vector<16x16xf32> to vector<16xf32>
    %48 = vector.shape_cast %47 : vector<16xf32> to vector<16x1xf32>
    %49 = tpu.reciprocal %48 {approx = true} : vector<16x1xf32> -> vector<16x1xf32>
    %50 = vector.broadcast %49 : vector<16x1xf32> to vector<16x16xf32>
    %51 = arith.mulf %46, %50 : vector<16x16xf32>
    %cst_24 = arith.constant dense<0.000000e+00> : vector<16x16xf32>
    %52 = tpu.matmul %51, %34, %cst_24 {dimension_numbers = #tpu.dot_dimension_numbers<[1], [0], [0], [1], [0, 0, 1, 1], [], []>} : vector<16x16xf32>, vector<16x16xf32>, vector<16x16xf32> -> vector<16x16xf32>
    %53 = vector.broadcast %35 : vector<1x16xf32> to vector<16x16xf32>
    %54 = arith.addf %52, %53 : vector<16x16xf32>
    %cst_25 = arith.constant 0.000000e+00 : f32
    %55 = vector.broadcast %cst_25 : f32 to vector<16x16xf32>
    %56 = arith.cmpf oge, %54, %55 : vector<16x16xf32>
    %cst_26 = arith.constant 0.00999999977 : f32
    %57 = vector.broadcast %cst_26 : f32 to vector<16x16xf32>
    %58 = arith.mulf %57, %54 : vector<16x16xf32>
    %59 = arith.select %56, %54, %58 : vector<16x16xi1>, vector<16x16xf32>
    %60 = tpu.concatenate %33, %59 in 1 : vector<16x16xf32>, vector<16x16xf32> -> vector<16x32xf32>
    %cst_27 = arith.constant dense<0.000000e+00> : vector<16x8xf32>
    %61 = tpu.matmul %60, %3, %cst_27 {dimension_numbers = #tpu.dot_dimension_numbers<[1], [0], [0], [1], [0, 0, 1, 1], [], []>} : vector<16x32xf32>, vector<32x8xf32>, vector<16x8xf32> -> vector<16x8xf32>
    %cst_28 = arith.constant dense<0.000000e+00> : vector<16x16xf32>
    %62 = tpu.matmul %61, %61, %cst_28 {dimension_numbers = #tpu.dot_dimension_numbers<[1], [1], [0], [0], [0, 0, 1, 0], [], []>} : vector<16x8xf32>, vector<16x8xf32>, vector<16x16xf32> -> vector<16x16xf32>
    %63 = arith.mulf %62, %0 : vector<16x16xf32>
    %cst_29 = arith.constant 0.000000e+00 : f32
    %64 = vector.broadcast %cst_29 : f32 to vector<16x16xf32>
    %65 = arith.cmpf oeq, %63, %64 : vector<16x16xf32>
    %cst_30 = arith.constant -1.000000e+16 : f32
    %66 = vector.broadcast %cst_30 : f32 to vector<16x16xf32>
    %67 = arith.select %65, %66, %63 : vector<16x16xi1>, vector<16x16xf32>
    %cst_31 = arith.constant dense<0xFF800000> : vector<16xf32>
    %68 = vector.multi_reduction <maximumf>, %67, %cst_31 [1] : vector<16x16xf32> to vector<16xf32>
    %69 = vector.shape_cast %68 : vector<16xf32> to vector<16x1xf32>
    %70 = vector.broadcast %69 : vector<16x1xf32> to vector<16x16xf32>
    %71 = arith.subf %67, %70 : vector<16x16xf32>
    %72 = math.exp %71 : vector<16x16xf32>
    %cst_32 = arith.constant dense<0.000000e+00> : vector<16xf32>
    %73 = vector.multi_reduction <add>, %72, %cst_32 [1] : vector<16x16xf32> to vector<16xf32>
    %74 = vector.shape_cast %73 : vector<16xf32> to vector<16x1xf32>
    %75 = tpu.reciprocal %74 {approx = true} : vector<16x1xf32> -> vector<16x1xf32>
    %76 = vector.broadcast %75 : vector<16x1xf32> to vector<16x16xf32>
    %77 = arith.mulf %72, %76 : vector<16x16xf32>
    %cst_33 = arith.constant dense<0.000000e+00> : vector<16x8xf32>
    %78 = tpu.matmul %77, %61, %cst_33 {dimension_numbers = #tpu.dot_dimension_numbers<[1], [0], [0], [1], [0, 0, 1, 1], [], []>} : vector<16x16xf32>, vector<16x8xf32>, vector<16x8xf32> -> vector<16x8xf32>
    %79 = vector.broadcast %4 : vector<1x8xf32> to vector<16x8xf32>
    %80 = arith.addf %78, %79 : vector<16x8xf32>
    %cst_34 = arith.constant 0.000000e+00 : f32
    %81 = vector.broadcast %cst_34 : f32 to vector<16x8xf32>
    %82 = arith.cmpf oge, %80, %81 : vector<16x8xf32>
    %cst_35 = arith.constant 0.00999999977 : f32
    %83 = vector.broadcast %cst_35 : f32 to vector<16x8xf32>
    %84 = arith.mulf %83, %80 : vector<16x8xf32>
    %85 = arith.select %82, %80, %84 : vector<16x8xi1>, vector<16x8xf32>
    %c0_36 = arith.constant 0 : index
    %c0_37 = arith.constant 0 : index
    %86 = vector.load %arg7[%c0_36, %c0_37] : memref<32x8xf32, #tpu.memory_space<vmem>>, vector<16x8xf32>
    tpu.vector_store %arg7[%c0_36, %c0_37], %85 {strides = array<i32>} : memref<32x8xf32, #tpu.memory_space<vmem>>, vector<16x8xf32>,
    %87 = vector.extract_strided_slice %6 {offsets = [16, 0], sizes = [16, 32], strides = [1, 1]} : vector<32x32xf32> to vector<16x32xf32>
    %88 = vector.extract_strided_slice %87 {offsets = [0, 0], sizes = [16, 16], strides = [1, 1]} : vector<16x32xf32> to vector<16x16xf32>
    %89 = vector.extract_strided_slice %2 {offsets = [0, 0], sizes = [1, 16], strides = [1, 1]} : vector<1x32xf32> to vector<1x16xf32>
    %cst_38 = arith.constant dense<0.000000e+00> : vector<16x16xf32>
    %90 = tpu.matmul %88, %88, %cst_38 {dimension_numbers = #tpu.dot_dimension_numbers<[1], [1], [0], [0], [0, 0, 1, 0], [], []>} : vector<16x16xf32>, vector<16x16xf32>, vector<16x16xf32> -> vector<16x16xf32>
    %91 = arith.mulf %90, %0 : vector<16x16xf32>
    %cst_39 = arith.constant 0.000000e+00 : f32
    %92 = vector.broadcast %cst_39 : f32 to vector<16x16xf32>
    %93 = arith.cmpf oeq, %91, %92 : vector<16x16xf32>
    %cst_40 = arith.constant -1.000000e+16 : f32
    %94 = vector.broadcast %cst_40 : f32 to vector<16x16xf32>
    %95 = arith.select %93, %94, %91 : vector<16x16xi1>, vector<16x16xf32>
    %cst_41 = arith.constant dense<0xFF800000> : vector<16xf32>
    %96 = vector.multi_reduction <maximumf>, %95, %cst_41 [1] : vector<16x16xf32> to vector<16xf32>
    %97 = vector.shape_cast %96 : vector<16xf32> to vector<16x1xf32>
    %98 = vector.broadcast %97 : vector<16x1xf32> to vector<16x16xf32>
    %99 = arith.subf %95, %98 : vector<16x16xf32>
    %100 = math.exp %99 : vector<16x16xf32>
    %cst_42 = arith.constant dense<0.000000e+00> : vector<16xf32>
    %101 = vector.multi_reduction <add>, %100, %cst_42 [1] : vector<16x16xf32> to vector<16xf32>
    %102 = vector.shape_cast %101 : vector<16xf32> to vector<16x1xf32>
    %103 = tpu.reciprocal %102 {approx = true} : vector<16x1xf32> -> vector<16x1xf32>
    %104 = vector.broadcast %103 : vector<16x1xf32> to vector<16x16xf32>
    %105 = arith.mulf %100, %104 : vector<16x16xf32>
    %cst_43 = arith.constant dense<0.000000e+00> : vector<16x16xf32>
    %106 = tpu.matmul %105, %88, %cst_43 {dimension_numbers = #tpu.dot_dimension_numbers<[1], [0], [0], [1], [0, 0, 1, 1], [], []>} : vector<16x16xf32>, vector<16x16xf32>, vector<16x16xf32> -> vector<16x16xf32>
    %107 = vector.broadcast %89 : vector<1x16xf32> to vector<16x16xf32>
    %108 = arith.addf %106, %107 : vector<16x16xf32>
    %cst_44 = arith.constant 0.000000e+00 : f32
    %109 = vector.broadcast %cst_44 : f32 to vector<16x16xf32>
    %110 = arith.cmpf oge, %108, %109 : vector<16x16xf32>
    %cst_45 = arith.constant 0.00999999977 : f32
    %111 = vector.broadcast %cst_45 : f32 to vector<16x16xf32>
    %112 = arith.mulf %111, %108 : vector<16x16xf32>
    %113 = arith.select %110, %108, %112 : vector<16x16xi1>, vector<16x16xf32>
    %114 = vector.extract_strided_slice %87 {offsets = [0, 16], sizes = [16, 16], strides = [1, 1]} : vector<16x32xf32> to vector<16x16xf32>
    %115 = vector.extract_strided_slice %2 {offsets = [0, 16], sizes = [1, 16], strides = [1, 1]} : vector<1x32xf32> to vector<1x16xf32>
    %cst_46 = arith.constant dense<0.000000e+00> : vector<16x16xf32>
    %116 = tpu.matmul %114, %114, %cst_46 {dimension_numbers = #tpu.dot_dimension_numbers<[1], [1], [0], [0], [0, 0, 1, 0], [], []>} : vector<16x16xf32>, vector<16x16xf32>, vector<16x16xf32> -> vector<16x16xf32>
    %117 = arith.mulf %116, %0 : vector<16x16xf32>
    %cst_47 = arith.constant 0.000000e+00 : f32
    %118 = vector.broadcast %cst_47 : f32 to vector<16x16xf32>
    %119 = arith.cmpf oeq, %117, %118 : vector<16x16xf32>
    %cst_48 = arith.constant -1.000000e+16 : f32
    %120 = vector.broadcast %cst_48 : f32 to vector<16x16xf32>
    %121 = arith.select %119, %120, %117 : vector<16x16xi1>, vector<16x16xf32>
    %cst_49 = arith.constant dense<0xFF800000> : vector<16xf32>
    %122 = vector.multi_reduction <maximumf>, %121, %cst_49 [1] : vector<16x16xf32> to vector<16xf32>
    %123 = vector.shape_cast %122 : vector<16xf32> to vector<16x1xf32>
    %124 = vector.broadcast %123 : vector<16x1xf32> to vector<16x16xf32>
    %125 = arith.subf %121, %124 : vector<16x16xf32>
    %126 = math.exp %125 : vector<16x16xf32>
    %cst_50 = arith.constant dense<0.000000e+00> : vector<16xf32>
    %127 = vector.multi_reduction <add>, %126, %cst_50 [1] : vector<16x16xf32> to vector<16xf32>
    %128 = vector.shape_cast %127 : vector<16xf32> to vector<16x1xf32>
    %129 = tpu.reciprocal %128 {approx = true} : vector<16x1xf32> -> vector<16x1xf32>
    %130 = vector.broadcast %129 : vector<16x1xf32> to vector<16x16xf32>
    %131 = arith.mulf %126, %130 : vector<16x16xf32>
    %cst_51 = arith.constant dense<0.000000e+00> : vector<16x16xf32>
    %132 = tpu.matmul %131, %114, %cst_51 {dimension_numbers = #tpu.dot_dimension_numbers<[1], [0], [0], [1], [0, 0, 1, 1], [], []>} : vector<16x16xf32>, vector<16x16xf32>, vector<16x16xf32> -> vector<16x16xf32>
    %133 = vector.broadcast %115 : vector<1x16xf32> to vector<16x16xf32>
    %134 = arith.addf %132, %133 : vector<16x16xf32>
    %cst_52 = arith.constant 0.000000e+00 : f32
    %135 = vector.broadcast %cst_52 : f32 to vector<16x16xf32>
    %136 = arith.cmpf oge, %134, %135 : vector<16x16xf32>
    %cst_53 = arith.constant 0.00999999977 : f32
    %137 = vector.broadcast %cst_53 : f32 to vector<16x16xf32>
    %138 = arith.mulf %137, %134 : vector<16x16xf32>
    %139 = arith.select %136, %134, %138 : vector<16x16xi1>, vector<16x16xf32>
    %140 = tpu.concatenate %113, %139 in 1 : vector<16x16xf32>, vector<16x16xf32> -> vector<16x32xf32>
    %cst_54 = arith.constant dense<0.000000e+00> : vector<16x8xf32>
    %141 = tpu.matmul %140, %3, %cst_54 {dimension_numbers = #tpu.dot_dimension_numbers<[1], [0], [0], [1], [0, 0, 1, 1], [], []>} : vector<16x32xf32>, vector<32x8xf32>, vector<16x8xf32> -> vector<16x8xf32>
    %cst_55 = arith.constant dense<0.000000e+00> : vector<16x16xf32>
    %142 = tpu.matmul %141, %141, %cst_55 {dimension_numbers = #tpu.dot_dimension_numbers<[1], [1], [0], [0], [0, 0, 1, 0], [], []>} : vector<16x8xf32>, vector<16x8xf32>, vector<16x16xf32> -> vector<16x16xf32>
    %143 = arith.mulf %142, %0 : vector<16x16xf32>
    %cst_56 = arith.constant 0.000000e+00 : f32
    %144 = vector.broadcast %cst_56 : f32 to vector<16x16xf32>
    %145 = arith.cmpf oeq, %143, %144 : vector<16x16xf32>
    %cst_57 = arith.constant -1.000000e+16 : f32
    %146 = vector.broadcast %cst_57 : f32 to vector<16x16xf32>
    %147 = arith.select %145, %146, %143 : vector<16x16xi1>, vector<16x16xf32>
    %cst_58 = arith.constant dense<0xFF800000> : vector<16xf32>
    %148 = vector.multi_reduction <maximumf>, %147, %cst_58 [1] : vector<16x16xf32> to vector<16xf32>
    %149 = vector.shape_cast %148 : vector<16xf32> to vector<16x1xf32>
    %150 = vector.broadcast %149 : vector<16x1xf32> to vector<16x16xf32>
    %151 = arith.subf %147, %150 : vector<16x16xf32>
    %152 = math.exp %151 : vector<16x16xf32>
    %cst_59 = arith.constant dense<0.000000e+00> : vector<16xf32>
    %153 = vector.multi_reduction <add>, %152, %cst_59 [1] : vector<16x16xf32> to vector<16xf32>
    %154 = vector.shape_cast %153 : vector<16xf32> to vector<16x1xf32>
    %155 = tpu.reciprocal %154 {approx = true} : vector<16x1xf32> -> vector<16x1xf32>
    %156 = vector.broadcast %155 : vector<16x1xf32> to vector<16x16xf32>
    %157 = arith.mulf %152, %156 : vector<16x16xf32>
    %cst_60 = arith.constant dense<0.000000e+00> : vector<16x8xf32>
    %158 = tpu.matmul %157, %141, %cst_60 {dimension_numbers = #tpu.dot_dimension_numbers<[1], [0], [0], [1], [0, 0, 1, 1], [], []>} : vector<16x16xf32>, vector<16x8xf32>, vector<16x8xf32> -> vector<16x8xf32>
    %159 = vector.broadcast %4 : vector<1x8xf32> to vector<16x8xf32>
    %160 = arith.addf %158, %159 : vector<16x8xf32>
    %cst_61 = arith.constant 0.000000e+00 : f32
    %161 = vector.broadcast %cst_61 : f32 to vector<16x8xf32>
    %162 = arith.cmpf oge, %160, %161 : vector<16x8xf32>
    %cst_62 = arith.constant 0.00999999977 : f32
    %163 = vector.broadcast %cst_62 : f32 to vector<16x8xf32>
    %164 = arith.mulf %163, %160 : vector<16x8xf32>
    %165 = arith.select %162, %160, %164 : vector<16x8xi1>, vector<16x8xf32>
    %c16 = arith.constant 16 : index
    %c0_63 = arith.constant 0 : index
    %166 = vector.load %arg7[%c16, %c0_63] : memref<32x8xf32, #tpu.memory_space<vmem>>, vector<16x8xf32>
    tpu.vector_store %arg7[%c16, %c0_63], %165 {strides = array<i32>} : memref<32x8xf32, #tpu.memory_space<vmem>>, vector<16x8xf32>,
    return
  }
  func.func @transform_0(%arg0: i32) -> (i32, i32) {
    %c0_i32 = arith.constant 0 : i32
    %c0_i32_0 = arith.constant 0 : i32
    %c0_i32_1 = arith.constant 0 : i32
    return %c0_i32, %c0_i32_0 : i32, i32
  }
  func.func @transform_1(%arg0: i32) -> (i32, i32) {
    %c0_i32 = arith.constant 0 : i32
    %c0_i32_0 = arith.constant 0 : i32
    %c0_i32_1 = arith.constant 0 : i32
    return %c0_i32, %c0_i32_0 : i32, i32
  }
  func.func @transform_2(%arg0: i32) -> (i32, i32) {
    %c0_i32 = arith.constant 0 : i32
    %c0_i32_0 = arith.constant 0 : i32
    %c0_i32_1 = arith.constant 0 : i32
    return %c0_i32, %c0_i32_0 : i32, i32
  }
  func.func @transform_3(%arg0: i32) -> (i32, i32) {
    %c0_i32 = arith.constant 0 : i32
    %c0_i32_0 = arith.constant 0 : i32
    %c0_i32_1 = arith.constant 0 : i32
    return %c0_i32, %c0_i32_0 : i32, i32
  }
  func.func @transform_4(%arg0: i32) -> (i32, i32) {
    %c0_i32 = arith.constant 0 : i32
    %c0_i32_0 = arith.constant 0 : i32
    %c0_i32_1 = arith.constant 0 : i32
    return %c0_i32, %c0_i32_0 : i32, i32
  }
  func.func @transform_5(%arg0: i32) -> (i32, i32) {
    %c0_i32 = arith.constant 0 : i32
    %c0_i32_0 = arith.constant 0 : i32
    %c0_i32_1 = arith.constant 0 : i32
    return %c0_i32, %c0_i32_0 : i32, i32
  }
  func.func @transform_6(%arg0: i32) -> (i32, i32) {
    %c0_i32 = arith.constant 0 : i32
    %c0_i32_0 = arith.constant 0 : i32
    %c0_i32_1 = arith.constant 0 : i32
    return %c0_i32, %c0_i32_0 : i32, i32
  }
}

</mosaic_0001>

<bundles_post_ra>
// kernel: tpu_custom_call.1
= control target key start
LH: loop header
LB: loop body
LE: loop exit
PB: predicated region body
PF: predicated region fallthrough
CT: control target
= control target key end

     0   :  { %vm36_vm0 = vcmask 64512   ;;  %vm78_vm1 = vcmask 130048   ;;  %s831_s27 = smov 112   ;;  %s832_s11 = smov 16   ;;  %vm283_vm9 = vcmask 261120   ;;  %s1039_s1 = inlined_call_operand.vmem [shape: f32[8,32], index: 1, kind: input, shape index: {}]   ;;  %s1040_s0 = inlined_call_operand.vmem [shape: f32[32,8], index: 0, kind: input, shape index: {}]   ;;  %s1041_s5 = inlined_call_operand.vmem [shape: f32[16,16], index: 5, kind: input, shape index: {}]   ;;  %s1042_s2 = inlined_call_operand.vmem [shape: f32[1,32], index: 2, kind: input, shape index: {}]   ;;  %s1043_s3 = inlined_call_operand.vmem [shape: f32[32,8], index: 3, kind: input, shape index: {}]   ;;  %s1044_s4 = inlined_call_operand.vmem [shape: f32[1,8], index: 4, kind: input, shape index: {}]   ;;  %s1045_s6 = inlined_call_operand.vmem [shape: f32[32,8], index: 6, kind: output, shape index: {}]  }
   0x1   :  { %v25_v0 = vld [vmem:[%s1039_s1] sm:$0xff]  ;;  %v33_v2 = vld [vmem:[%s1040_s0 + $0x8] sm:$0xff]  ;;  %v34_v59 = vld [vmem:[%s1040_s0 + $0x10] sm:$0xff] }
   0x2   :  { %v32_v1 = vld [vmem:[%s1040_s0] sm:$0xff]  ;;  %64 = vmatpush.msra.mxu0 %v25_v0  ;;  %v899_v12 = vld [vmem:[%s1041_s5 + $0x8] sm:$0xff]  ;;  %v35_v60 = vld [vmem:[%s1040_s0 + $0x18] sm:$0xff] }
   0x3   :  { %735 = vmatmul.msk.f32.vlgmr.msra.gmra.mxu0 %vm36_vm0, %v32_v1  ;;  %v891_v7 = vld [vmem:[%s1041_s5] sm:$0xff] }
   0x4   :  { %v916_v51 = vld [vmem:[%s1042_s2] ss:$0 sm:$0xff] }
   0xb   :  { %736 = vmatmul.msk.f32.gmra.mxu0 %vm36_vm0, %v33_v2 }
  0x13   :  { %737 = vmatmul.msk.f32.gmra.mxu0 %vm36_vm0, %v34_v59 }
  0x1b   :  { %738 = vmatmul.msk.f32.gmra.mxu0 %vm36_vm0, %v35_v60 }
  0x80   :  { %v66_v3 = vpop.f32.mrf.mxu0 }
  0x88   :  { %v69_v4 = vpop.f32.mrf.mxu0 }
  0x89   :  { %176 = vrot.lane.b32.xlu0 %v69_v4, %s831_s27  ;;  %739 = vmatpush.xpose.msk.msra.mxu1 %vm78_vm1, %v69_v4 }
  0x8a   :  { %159 = vmatpush.msra.mxu2 %v69_v4 }
  0x8c   :  { %160 = vmatpush.msra.mxu2 %v66_v3 }
  0x8d   :  { %740 = vmatpush.xpose.msk.msra.mxu1 %vm78_vm1, %v66_v3 }
  0x90   :  { %741 = vmatmul.msk.f32.vlgmr.msra.gmra.mxu1 %vm78_vm1, %v66_v3 }
  0x91   :  { %174 = vrot.lane.b32.xlu0 %v66_v3, %s831_s27 }
  0x98   :  { %742 = vmatmul.msk.f32.gmra.mxu1 %vm78_vm1, %v69_v4 }
  0xfb   :  { %v177_v5 = vpop.permute.xlu0 %176 }
  0xfc   :  { %745 = vmatpush.xpose.msk.msra.mxu3 %vm78_vm1, %v177_v5  ;;  %258 = vmatpush.msrb.mxu2 %v177_v5 }
 0x103   :  { %v175_v6 = vpop.permute.xlu0 %174 }
 0x104   :  { %746 = vmatpush.xpose.msk.msra.mxu3 %vm78_vm1, %v175_v6  ;;  %259 = vmatpush.msrb.mxu2 %v175_v6 }
 0x107   :  { %747 = vmatmul.msk.f32.vlgmr.msra.gmra.mxu3 %vm78_vm1, %v175_v6 }
 0x10d   :  { %v102_v8 = vpop.f32.mrf.mxu1 }
 0x10e   :  { %v108_v9 = vmul.f32 %v102_v8, %v891_v7  ;;  %v30_v8 = vld [vmem:[%s1043_s3 + $0x18] sm:$0xff] }
 0x10f   :  { %748 = vmatmul.msk.f32.gmra.mxu3 %vm78_vm1, %v177_v5  ;;  %302 = vmatpush.msrb.mxu1 %v30_v8 }
 0x110   :  { %vm110_vm2 = vcmp.eq.f32.partialorder %v108_v9, 0.0 }
 0x111   :  { %v112_v10 = vsel %vm110_vm2, -1e+16, %v108_v9  ;;  %v29_v9 = vld [vmem:[%s1043_s3 + $0x10] sm:$0xff] }
 0x112   :  { %v114_v11 = vsel %vm78_vm1, %v112_v10, -inf  ;;  %303 = vmatpush.msrb.mxu1 %v29_v9 }
 0x113   :  { %115 = vmax.xlane.f32.xlu1 %v114_v11  ;;  %v27_v11 = vld [vmem:[%s1043_s3] sm:$0xff] }
 0x115   :  { %v105_v13 = vpop.f32.mrf.mxu1 }
 0x116   :  { %v109_v14 = vmul.f32 %v105_v13, %v899_v12  ;;  %v72_v13 = vpop.f32.mrf.mxu0 }
 0x118   :  { %vm111_vm3 = vcmp.eq.f32.partialorder %v109_v14, 0.0 }
 0x119   :  { %v113_v15 = vsel %vm111_vm3, -1e+16, %v109_v14 }
 0x11a   :  { %v117_v16 = vsel %vm78_vm1, %v113_v15, -inf }
 0x11b   :  { %118 = vmax.xlane.f32.xlu1 %v117_v16 }
 0x11e   :  { %v75_v16 = vpop.f32.mrf.mxu0 }
 0x186   :  { %v116_v17 = vpop.xlane.xlu1 %115 }
 0x187   :  { %v120_v18 = vsub.f32 %v112_v10, %v116_v17  ;;  %v28_v10 = vld [vmem:[%s1043_s3 + $0x8] sm:$0xff] }
 0x188   :  { %304 = vmatpush.msrb.mxu1 %v28_v10 }
 0x189   :  { %v122_v19 = vmul.f32 1.442695, %v120_v18 }
 0x18a   :  { %v199_v20 = vpop.f32.mrf.mxu3  ;;  %305 = vmatpush.msrb.mxu1 %v27_v11 }
 0x18b   :  { %783 = vpow2.f32 %v122_v19  ;;  %v205_v21 = vmul.f32 %v199_v20, %v891_v7 }
 0x18c   :  { %487 = vmatpush.msra.mxu1 %v75_v16 }
 0x18d   :  { %vm207_vm4 = vcmp.eq.f32.partialorder %v205_v21, 0.0 }
 0x18e   :  { %v119_v22 = vpop.xlane.xlu1 %118  ;;  %v209_v23 = vsel %vm207_vm4, -1e+16, %v205_v21  ;;  %488 = vmatpush.msra.mxu1 %v72_v13 }
 0x18f   :  { %v121_v24 = vsub.f32 %v113_v15, %v119_v22  ;;  %v211_v25 = vsel %vm78_vm1, %v209_v23, -inf }
 0x190   :  { %212 = vmax.xlane.f32.xlu2 %v211_v25 }
 0x191   :  { %v784_v26 = vpop.eup %783  ;;  %v124_v27 = vmul.f32 1.442695, %v121_v24 }
 0x192   :  { %v202_v28 = vpop.f32.mrf.mxu3  ;;  %v126_v29 = vsel %vm78_vm1, %v784_v26, 0.0 }
 0x193   :  { %785 = vpow2.f32 %v124_v27  ;;  %v206_v30 = vmul.f32 %v202_v28, %v899_v12  ;;  %127 = vadd.xlane.f32.xlu0 %v126_v29 }
 0x195   :  { %vm208_vm5 = vcmp.eq.f32.partialorder %v206_v30, 0.0 }
 0x196   :  { %v210_v31 = vsel %vm208_vm5, -1e+16, %v206_v30 }
 0x197   :  { %v214_v32 = vsel %vm78_vm1, %v210_v31, -inf }
 0x198   :  { %215 = vmax.xlane.f32.xlu2 %v214_v32 }
 0x199   :  { %v786_v33 = vpop.eup %785 }
 0x19a   :  { %v129_v34 = vsel %vm78_vm1, %v786_v33, 0.0 }
 0x19b   :  { %130 = vadd.xlane.f32.xlu1 %v129_v34 }
 0x203   :  { %v213_v35 = vpop.xlane.xlu2 %212 }
 0x204   :  { %v217_v36 = vsub.f32 %v209_v23, %v213_v35 }
 0x206   :  { %v219_v37 = vmul.f32 1.442695, %v217_v36  ;;  %v128_v38 = vpop.xlane.xlu0 %127 }
 0x207   :  { %787 = vrcp.f32 %v128_v38 }
 0x208   :  { %789 = vpow2.f32 %v219_v37 }
 0x20b   :  { %v216_v39 = vpop.xlane.xlu2 %215 }
 0x20c   :  { %v218_v40 = vsub.f32 %v210_v31, %v216_v39 }
 0x20d   :  { %v788_v41 = vpop.eup %787 }
 0x20e   :  { %v790_v42 = vpop.eup %789  ;;  %v221_v43 = vmul.f32 1.442695, %v218_v40  ;;  %v131_v44 = vpop.xlane.xlu1 %130  ;;  %v134_v45 = vmul.f32 %v788_v41, %v784_v26 }
 0x20f   :  { %791 = vrcp.f32 %v131_v44  ;;  %v223_v46 = vsel %vm78_vm1, %v790_v42, 0.0 }
 0x210   :  { %793 = vpow2.f32 %v221_v43  ;;  %224 = vadd.xlane.f32.xlu2 %v223_v46  ;;  %743 = vmatmul.msk.f32.vlgmr.msra.gmra.mxu2 %vm78_vm1, %v134_v45 }
 0x211   :  { %759 = vmatpush.xpose.msk.msra.mxu2 %vm78_vm1, %v75_v16 }
 0x215   :  { %v792_v47 = vpop.eup %791  ;;  %760 = vmatpush.xpose.msk.msra.mxu2 %vm78_vm1, %v72_v13 }
 0x216   :  { %v794_v48 = vpop.eup %793  ;;  %v135_v49 = vmul.f32 %v792_v47, %v786_v33 }
 0x217   :  { %v226_v50 = vsel %vm78_vm1, %v794_v48, 0.0 }
 0x218   :  { %227 = vadd.xlane.f32.xlu1 %v226_v50  ;;  %744 = vmatmul.msk.f32.gmra.mxu2 %vm78_vm1, %v135_v49 }
 0x228   :  { %235 = vrot.lane.b32.xlu2 %v916_v51, %s831_s27 }
 0x283   :  { %v225_v52 = vpop.xlane.xlu2 %224 }
 0x284   :  { %795 = vrcp.f32 %v225_v52 }
 0x28a   :  { %v796_v53 = vpop.eup %795 }
 0x28b   :  { %v228_v54 = vpop.xlane.xlu1 %227  ;;  %v231_v55 = vmul.f32 %v796_v53, %v790_v42  ;;  %v930_v62 = vpop.permute.xlu2 %235 }
 0x28c   :  { %797 = vrcp.f32 %v228_v54 }
 0x28d   :  { %749 = vmatmul.msk.f32.vlgmr.msrb.gmra.mxu2 %vm78_vm1, %v231_v55 }
 0x28e   :  { %626 = vmatpush.msrb.mxu2 %v30_v8 }
 0x290   :  { %627 = vmatpush.msrb.mxu2 %v29_v9 }
 0x292   :  { %v798_v56 = vpop.eup %797  ;;  %628 = vmatpush.msrb.mxu2 %v28_v10 }
 0x293   :  { %v232_v57 = vmul.f32 %v798_v56, %v794_v48  ;;  %v162_v58 = vpop.f32.mrf.mxu2 }
 0x294   :  { %v163_v14 = vadd.f32 %v916_v51, %v162_v58  ;;  %629 = vmatpush.msrb.mxu2 %v27_v11 }
 0x295   :  { %750 = vmatmul.msk.f32.gmra.mxu2 %vm78_vm1, %v232_v57 }
 0x296   :  { %v170_v15 = vmul.f32 0.01, %v163_v14  ;;  %vm168_vm8 = vcmp.ge.f32.partialorder %v163_v14, 0.0 }
 0x298   :  { %v172_v18 = vsel %vm168_vm8, %v163_v14, %v170_v15 }
 0x29b   :  { %v165_v61 = vpop.f32.mrf.mxu2 }
 0x29c   :  { %v166_v17 = vadd.f32 %v916_v51, %v165_v61 }
 0x29d   :  { %761 = vmatmul.msk.f32.vlgmr.msra.gmra.mxu2 %vm78_vm1, %v72_v13 }
 0x29e   :  { %v171_v21 = vmul.f32 0.01, %v166_v17  ;;  %vm169_vm10 = vcmp.ge.f32.partialorder %v166_v17, 0.0 }
 0x2a0   :  { %v173_v23 = vsel %vm169_vm10, %v166_v17, %v171_v21 }
 0x2a5   :  { %762 = vmatmul.msk.f32.gmra.mxu2 %vm78_vm1, %v75_v16 }
 0x310   :  { %v261_v63 = vpop.f32.mrf.mxu2 }
 0x311   :  { %v262_v0 = vadd.f32 %v261_v63, %v930_v62 }
 0x313   :  { %v269_v1 = vmul.f32 0.01, %v262_v0  ;;  %vm267_vm6 = vcmp.ge.f32.partialorder %v262_v0, 0.0 }
 0x315   :  { %v271_v2 = vsel %vm267_vm6, %v262_v0, %v269_v1 }
 0x316   :  { %275 = vrot.lane.b32.xlu1 %v271_v2, %s832_s11 }
 0x318   :  { %v264_v3 = vpop.f32.mrf.mxu2 }
 0x319   :  { %v265_v4 = vadd.f32 %v264_v3, %v930_v62 }
 0x31b   :  { %v270_v5 = vmul.f32 0.01, %v265_v4  ;;  %vm268_vm7 = vcmp.ge.f32.partialorder %v265_v4, 0.0 }
 0x31d   :  { %v272_v6 = vsel %vm268_vm7, %v265_v4, %v270_v5 }
 0x31e   :  { %277 = vrot.lane.b32.xlu2 %v272_v6, %s832_s11  ;;  %502 = vrot.lane.b32.xlu1 %v72_v13, %s831_s27 }
 0x320   :  { %v433_v41 = vpop.f32.mrf.mxu2 }
 0x321   :  { %v439_v44 = vmul.f32 %v433_v41, %v891_v7 }
 0x323   :  { %vm441_vm15 = vcmp.eq.f32.partialorder %v439_v44, 0.0 }
 0x324   :  { %v443_v47 = vsel %vm441_vm15, -1e+16, %v439_v44 }
 0x325   :  { %v445_v48 = vsel %vm78_vm1, %v443_v47, -inf }
 0x326   :  { %504 = vrot.lane.b32.xlu2 %v75_v16, %s831_s27 }
 0x328   :  { %v436_v58 = vpop.f32.mrf.mxu2 }
 0x329   :  { %v440_v61 = vmul.f32 %v436_v58, %v899_v12 }
 0x32b   :  { %vm442_vm2 = vcmp.eq.f32.partialorder %v440_v61, 0.0 }
 0x32c   :  { %v444_v4 = vsel %vm442_vm2, -1e+16, %v440_v61 }
 0x32d   :  { %v448_v9 = vsel %vm78_vm1, %v444_v4, -inf }
 0x378   :  { %v278_v22 = vpop.permute.xlu2 %277 }
 0x379   :  { %v282_v24 = vsel %vm78_vm1, %v173_v23, %v278_v22 }
 0x380   :  { %v505_v27 = vpop.permute.xlu2 %504 }
 0x388   :  { %v276_v19 = vpop.permute.xlu1 %275 }
 0x389   :  { %v281_v20 = vsel %vm78_vm1, %v172_v18, %v276_v19 }
 0x38a   :  { %751 = vmatmul.msk.f32.vlgmr.msrb.gmra.mxu1 %vm283_vm9, %v281_v20 }
 0x390   :  { %v503_v28 = vpop.permute.xlu1 %502 }
 0x392   :  { %752 = vmatmul.msk.f32.gmra.mxu1 %vm283_vm9, %v282_v24 }
 0x407   :  { %v307_v25 = vpop.f32.mrf.mxu1 }
 0x40f   :  { %v310_v26 = vpop.f32.mrf.mxu1 }
 0x410   :  { %753 = vmatpush.xpose.msk.msrb.mxu3 %vm36_vm0, %v310_v26  ;;  %393 = vmatpush.msrb.mxu0 %v310_v26 }
 0x412   :  { %394 = vmatpush.msrb.mxu0 %v307_v25 }
 0x414   :  { %583 = vmatpush.msra.mxu0 %v505_v27  ;;  %754 = vmatpush.xpose.msk.msrb.mxu3 %vm36_vm0, %v307_v25 }
 0x416   :  { %584 = vmatpush.msra.mxu0 %v503_v28 }
 0x417   :  { %755 = vmatmul.msk.f32.vlgmr.msrb.gmra.mxu3 %vm36_vm0, %v307_v25 }
 0x418   :  { %765 = vmatpush.xpose.msk.msra.mxu3 %vm78_vm1, %v505_v27 }
 0x41c   :  { %766 = vmatpush.xpose.msk.msra.mxu3 %vm78_vm1, %v503_v28 }
 0x41f   :  { %756 = vmatmul.msk.f32.gmra.mxu3 %vm36_vm0, %v310_v26 }
 0x427   :  { %767 = vmatmul.msk.f32.vlgmr.msra.gmra.mxu3 %vm78_vm1, %v503_v28 }
 0x42f   :  { %768 = vmatmul.msk.f32.gmra.mxu3 %vm78_vm1, %v505_v27 }
 0x49a   :  { %v336_v29 = vpop.f32.mrf.mxu3 }
 0x49b   :  { %v342_v30 = vmul.f32 %v336_v29, %v891_v7 }
 0x49d   :  { %vm344_vm11 = vcmp.eq.f32.partialorder %v342_v30, 0.0 }
 0x49e   :  { %v346_v31 = vsel %vm344_vm11, -1e+16, %v342_v30 }
 0x49f   :  { %v348_v32 = vsel %vm78_vm1, %v346_v31, -inf }
 0x4a0   :  { %349 = vmax.xlane.f32.xlu0 %v348_v32 }
 0x4a2   :  { %v339_v33 = vpop.f32.mrf.mxu3 }
 0x4a3   :  { %v343_v34 = vmul.f32 %v339_v33, %v899_v12 }
 0x4a5   :  { %vm345_vm12 = vcmp.eq.f32.partialorder %v343_v34, 0.0 }
 0x4a6   :  { %v347_v35 = vsel %vm345_vm12, -1e+16, %v343_v34 }
 0x4a7   :  { %v351_v36 = vsel %vm78_vm1, %v347_v35, -inf }
 0x4a8   :  { %352 = vmax.xlane.f32.xlu2 %v351_v36 }
 0x4aa   :  { %v527_v37 = vpop.f32.mrf.mxu3 }
 0x4ab   :  { %v533_v38 = vmul.f32 %v527_v37, %v891_v7 }
 0x4ad   :  { %vm535_vm13 = vcmp.eq.f32.partialorder %v533_v38, 0.0 }
 0x4ae   :  { %v537_v39 = vsel %vm535_vm13, -1e+16, %v533_v38  ;;  %v994_v38 = vld [vmem:[%s1044_s4] ss:$0 sm:$0xff] }
 0x4af   :  { %v539_v40 = vsel %vm78_vm1, %v537_v39, -inf }
 0x4b0   :  { %540 = vmax.xlane.f32.xlu1 %v539_v40 }
 0x4b2   :  { %v530_v42 = vpop.f32.mrf.mxu3 }
 0x4b3   :  { %v534_v43 = vmul.f32 %v530_v42, %v899_v12 }
 0x4b5   :  { %vm536_vm14 = vcmp.eq.f32.partialorder %v534_v43, 0.0 }
 0x4b6   :  { %v538_v45 = vsel %vm536_vm14, -1e+16, %v534_v43 }
 0x4b7   :  { %v542_v46 = vsel %vm78_vm1, %v538_v45, -inf }
 0x4b8   :  { %543 = vmax.xlane.f32.xlu0 %v542_v46 }
 0x4c0   :  { %446 = vmax.xlane.f32.xlu0 %v445_v48 }
 0x513   :  { %v350_v49 = vpop.xlane.xlu0 %349 }
 0x514   :  { %v354_v50 = vsub.f32 %v346_v31, %v350_v49 }
 0x516   :  { %v356_v52 = vmul.f32 1.442695, %v354_v50 }
 0x518   :  { %799 = vpow2.f32 %v356_v52 }
 0x51b   :  { %v353_v53 = vpop.xlane.xlu2 %352 }
 0x51c   :  { %v355_v54 = vsub.f32 %v347_v35, %v353_v53 }
 0x51e   :  { %v800_v55 = vpop.eup %799  ;;  %v358_v56 = vmul.f32 1.442695, %v355_v54 }
 0x51f   :  { %v360_v57 = vsel %vm78_vm1, %v800_v55, 0.0 }
 0x520   :  { %801 = vpow2.f32 %v358_v56  ;;  %361 = vadd.xlane.f32.xlu0 %v360_v57 }
 0x523   :  { %v541_v59 = vpop.xlane.xlu1 %540 }
 0x524   :  { %v545_v60 = vsub.f32 %v537_v39, %v541_v59 }
 0x526   :  { %v802_v63 = vpop.eup %801  ;;  %v547_v0 = vmul.f32 1.442695, %v545_v60 }
 0x527   :  { %v363_v1 = vsel %vm78_vm1, %v802_v63, 0.0 }
 0x528   :  { %803 = vpow2.f32 %v547_v0  ;;  %364 = vadd.xlane.f32.xlu0 %v363_v1 }
 0x52b   :  { %v544_v2 = vpop.xlane.xlu0 %543 }
 0x52c   :  { %v546_v3 = vsub.f32 %v538_v45, %v544_v2 }
 0x52e   :  { %v804_v5 = vpop.eup %803  ;;  %v549_v6 = vmul.f32 1.442695, %v546_v3 }
 0x52f   :  { %v551_v8 = vsel %vm78_vm1, %v804_v5, 0.0 }
 0x530   :  { %805 = vpow2.f32 %v549_v6  ;;  %552 = vadd.xlane.f32.xlu2 %v551_v8  ;;  %449 = vmax.xlane.f32.xlu0 %v448_v9 }
 0x533   :  { %v447_v10 = vpop.xlane.xlu0 %446 }
 0x534   :  { %v451_v11 = vsub.f32 %v443_v47, %v447_v10 }
 0x536   :  { %v806_v13 = vpop.eup %805  ;;  %v453_v14 = vmul.f32 1.442695, %v451_v11 }
 0x537   :  { %v554_v15 = vsel %vm78_vm1, %v806_v13, 0.0 }
 0x538   :  { %807 = vpow2.f32 %v453_v14  ;;  %555 = vadd.xlane.f32.xlu0 %v554_v15 }
 0x53e   :  { %v808_v16 = vpop.eup %807 }
 0x53f   :  { %v457_v17 = vsel %vm78_vm1, %v808_v16, 0.0 }
 0x540   :  { %458 = vadd.xlane.f32.xlu1 %v457_v17 }
 0x593   :  { %v362_v18 = vpop.xlane.xlu0 %361 }
 0x594   :  { %809 = vrcp.f32 %v362_v18 }
 0x59a   :  { %v810_v19 = vpop.eup %809 }
 0x59b   :  { %v365_v20 = vpop.xlane.xlu0 %364  ;;  %v368_v21 = vmul.f32 %v810_v19, %v800_v55 }
 0x59c   :  { %811 = vrcp.f32 %v365_v20 }
 0x59d   :  { %757 = vmatmul.msk.f32.vlgmr.msrb.gmra.mxu0 %vm78_vm1, %v368_v21 }
 0x5a2   :  { %v812_v22 = vpop.eup %811 }
 0x5a3   :  { %v553_v23 = vpop.xlane.xlu2 %552  ;;  %v450_v24 = vpop.xlane.xlu0 %449  ;;  %v369_v25 = vmul.f32 %v812_v22, %v802_v63 }
 0x5a4   :  { %813 = vrcp.f32 %v553_v23  ;;  %v452_v26 = vsub.f32 %v444_v4, %v450_v24 }
 0x5a5   :  { %758 = vmatmul.msk.f32.gmra.mxu0 %vm78_vm1, %v369_v25 }
 0x5a6   :  { %v455_v27 = vmul.f32 1.442695, %v452_v26 }
 0x5a8   :  { %815 = vpow2.f32 %v455_v27 }
 0x5aa   :  { %v814_v28 = vpop.eup %813 }
 0x5ab   :  { %v559_v29 = vmul.f32 %v814_v28, %v804_v5  ;;  %v556_v30 = vpop.xlane.xlu0 %555 }
 0x5ac   :  { %817 = vrcp.f32 %v556_v30 }
 0x5ad   :  { %769 = vmatmul.msk.f32.vlgmr.msra.gmra.mxu0 %vm78_vm1, %v559_v29 }
 0x5ae   :  { %v816_v31 = vpop.eup %815 }
 0x5af   :  { %v460_v32 = vsel %vm78_vm1, %v816_v31, 0.0 }
 0x5b0   :  { %461 = vadd.xlane.f32.xlu2 %v460_v32 }
 0x5b2   :  { %v818_v33 = vpop.eup %817 }
 0x5b3   :  { %v459_v34 = vpop.xlane.xlu1 %458  ;;  %v560_v35 = vmul.f32 %v818_v33, %v806_v13 }
 0x5b4   :  { %819 = vrcp.f32 %v459_v34 }
 0x5b5   :  { %770 = vmatmul.msk.f32.gmra.mxu0 %vm78_vm1, %v560_v35 }
 0x5ba   :  { %v820_v36 = vpop.eup %819 }
 0x5bb   :  { %v465_v37 = vmul.f32 %v820_v36, %v808_v16 }
 0x5bd   :  { %763 = vmatmul.msk.f32.vlgmr.msra.gmra.mxu1 %vm78_vm1, %v465_v37 }
 0x61a   :  { %v396_v39 = vpop.f32.mrf.mxu0 }
 0x61b   :  { %v397_v40 = vadd.f32 %v994_v38, %v396_v39 }
 0x61d   :  { %vm402_vm3 = vcmp.ge.f32.partialorder %v397_v40, 0.0  ;;  %v404_v41 = vmul.f32 0.01, %v397_v40 }
 0x61f   :  { %v406_v42 = vsel %vm402_vm3, %v397_v40, %v404_v41 }
 0x620   :  { %408 = vst.msk [vmem:[%s1045_s6] sm:$0xff] %vm36_vm0, %v406_v42 }
 0x622   :  { %v399_v43 = vpop.f32.mrf.mxu0 }
 0x623   :  { %v400_v44 = vadd.f32 %v994_v38, %v399_v43  ;;  %v462_v45 = vpop.xlane.xlu2 %461 }
 0x624   :  { %821 = vrcp.f32 %v462_v45 }
 0x625   :  { %vm403_vm4 = vcmp.ge.f32.partialorder %v400_v44, 0.0  ;;  %v405_v46 = vmul.f32 0.01, %v400_v44 }
 0x627   :  { %v407_v47 = vsel %vm403_vm4, %v400_v44, %v405_v46 }
 0x628   :  { %409 = vst.msk [vmem:[%s1045_s6 + $0x8] sm:$0xff] %vm36_vm0, %v407_v47 }
 0x62a   :  { %v822_v48 = vpop.eup %821  ;;  %v586_v49 = vpop.f32.mrf.mxu0 }
 0x62b   :  { %v587_v50 = vadd.f32 %v586_v49, %v930_v62  ;;  %v466_v52 = vmul.f32 %v822_v48, %v816_v31 }
 0x62d   :  { %v594_v53 = vmul.f32 0.01, %v587_v50  ;;  %764 = vmatmul.msk.f32.gmra.mxu1 %vm78_vm1, %v466_v52  ;;  %vm592_vm5 = vcmp.ge.f32.partialorder %v587_v50, 0.0 }
 0x62f   :  { %v596_v54 = vsel %vm592_vm5, %v587_v50, %v594_v53 }
 0x630   :  { %600 = vrot.lane.b32.xlu0 %v596_v54, %s832_s11 }
 0x632   :  { %v589_v55 = vpop.f32.mrf.mxu0 }
 0x633   :  { %v590_v56 = vadd.f32 %v589_v55, %v930_v62 }
 0x635   :  { %v595_v57 = vmul.f32 0.01, %v590_v56  ;;  %vm593_vm6 = vcmp.ge.f32.partialorder %v590_v56, 0.0 }
 0x637   :  { %v597_v58 = vsel %vm593_vm6, %v590_v56, %v595_v57 }
 0x638   :  { %602 = vrot.lane.b32.xlu1 %v597_v58, %s832_s11 }
 0x63a   :  { %v490_v59 = vpop.f32.mrf.mxu1 }
 0x63b   :  { %v491_v60 = vadd.f32 %v916_v51, %v490_v59 }
 0x63d   :  { %v498_v61 = vmul.f32 0.01, %v491_v60  ;;  %vm496_vm7 = vcmp.ge.f32.partialorder %v491_v60, 0.0 }
 0x63f   :  { %v500_v63 = vsel %vm496_vm7, %v491_v60, %v498_v61 }
 0x6a2   :  { %v601_v0 = vpop.permute.xlu0 %600 }
 0x6a3   :  { %v606_v1 = vsel %vm78_vm1, %v500_v63, %v601_v0 }
 0x6a4   :  { %771 = vmatmul.msk.f32.vlgmr.msrb.gmra.mxu2 %vm283_vm9, %v606_v1 }
 0x6aa   :  { %v493_v2 = vpop.f32.mrf.mxu1  ;;  %v603_v4 = vpop.permute.xlu1 %602 }
 0x6ab   :  { %v494_v3 = vadd.f32 %v916_v51, %v493_v2 }
 0x6ad   :  { %vm497_vm8 = vcmp.ge.f32.partialorder %v494_v3, 0.0  ;;  %v499_v62 = vmul.f32 0.01, %v494_v3 }
 0x6af   :  { %v501_v5 = vsel %vm497_vm8, %v494_v3, %v499_v62 }
 0x6b0   :  { %v607_v6 = vsel %vm78_vm1, %v501_v5, %v603_v4 }
 0x6b1   :  { %772 = vmatmul.msk.f32.gmra.mxu2 %vm283_vm9, %v607_v6 }
 0x727   :  { %v631_v8 = vpop.f32.mrf.mxu2 }
 0x734   :  { %v634_v9 = vpop.f32.mrf.mxu2 }
 0x735   :  { %773 = vmatpush.xpose.msk.msrb.mxu1 %vm36_vm0, %v634_v9  ;;  %714 = vmatpush.msrb.mxu3 %v634_v9 }
 0x737   :  { %715 = vmatpush.msrb.mxu3 %v631_v8 }
 0x739   :  { %774 = vmatpush.xpose.msk.msrb.mxu1 %vm36_vm0, %v631_v8 }
 0x73c   :  { %775 = vmatmul.msk.f32.vlgmr.msrb.gmra.mxu1 %vm36_vm0, %v631_v8 }
 0x744   :  { %776 = vmatmul.msk.f32.gmra.mxu1 %vm36_vm0, %v634_v9 }
 0x7b9   :  { %v660_v51 = vpop.f32.mrf.mxu1 }
 0x7ba   :  { %v666_v10 = vmul.f32 %v660_v51, %v891_v7 }
 0x7bc   :  { %vm668_vm10 = vcmp.eq.f32.partialorder %v666_v10, 0.0 }
 0x7bd   :  { %v670_v11 = vsel %vm668_vm10, -1e+16, %v666_v10 }
 0x7be   :  { %v672_v13 = vsel %vm78_vm1, %v670_v11, -inf }
 0x7bf   :  { %673 = vmax.xlane.f32.xlu2 %v672_v13 }
 0x7c1   :  { %v663_v14 = vpop.f32.mrf.mxu1 }
 0x7c2   :  { %v667_v15 = vmul.f32 %v663_v14, %v899_v12 }
 0x7c4   :  { %vm669_vm9 = vcmp.eq.f32.partialorder %v667_v15, 0.0 }
 0x7c5   :  { %v671_v16 = vsel %vm669_vm9, -1e+16, %v667_v15 }
 0x7c6   :  { %v675_v17 = vsel %vm78_vm1, %v671_v16, -inf }
 0x7c7   :  { %676 = vmax.xlane.f32.xlu2 %v675_v17 }
 0x832   :  { %v674_v18 = vpop.xlane.xlu2 %673 }
 0x833   :  { %v678_v19 = vsub.f32 %v670_v11, %v674_v18 }
 0x835   :  { %v680_v20 = vmul.f32 1.442695, %v678_v19 }
 0x837   :  { %823 = vpow2.f32 %v680_v20 }
 0x83a   :  { %v677_v21 = vpop.xlane.xlu2 %676 }
 0x83b   :  { %v679_v22 = vsub.f32 %v671_v16, %v677_v21 }
 0x83d   :  { %v824_v7 = vpop.eup %823  ;;  %v682_v23 = vmul.f32 1.442695, %v679_v22 }
 0x83e   :  { %v684_v24 = vsel %vm78_vm1, %v824_v7, 0.0 }
 0x83f   :  { %825 = vpow2.f32 %v682_v23  ;;  %685 = vadd.xlane.f32.xlu0 %v684_v24 }
 0x845   :  { %v826_v25 = vpop.eup %825 }
 0x846   :  { %v687_v12 = vsel %vm78_vm1, %v826_v25, 0.0 }
 0x847   :  { %688 = vadd.xlane.f32.xlu2 %v687_v12 }
 0x8b2   :  { %v686_v26 = vpop.xlane.xlu0 %685 }
 0x8b3   :  { %827 = vrcp.f32 %v686_v26 }
 0x8b9   :  { %v828_v27 = vpop.eup %827 }
 0x8ba   :  { %v692_v28 = vmul.f32 %v828_v27, %v824_v7  ;;  %v689_v29 = vpop.xlane.xlu2 %688 }
 0x8bb   :  { %829 = vrcp.f32 %v689_v29 }
 0x8bc   :  { %777 = vmatmul.msk.f32.vlgmr.msrb.gmra.mxu3 %vm78_vm1, %v692_v28 }
 0x8c1   :  { %v830_v30 = vpop.eup %829 }
 0x8c2   :  { %v693_v31 = vmul.f32 %v830_v30, %v826_v25 }
 0x8c4   :  { %778 = vmatmul.msk.f32.gmra.mxu3 %vm78_vm1, %v693_v31 }
 0x93f   :  { %v717_v32 = vpop.f32.mrf.mxu3 }
 0x940   :  { %v718_v33 = vadd.f32 %v994_v38, %v717_v32 }
 0x942   :  { %vm723_vm11 = vcmp.ge.f32.partialorder %v718_v33, 0.0  ;;  %v725_v34 = vmul.f32 0.01, %v718_v33 }
 0x944   :  { %v727_v35 = vsel %vm723_vm11, %v718_v33, %v725_v34 }
 0x945   :  { %729 = vst.msk [vmem:[%s1045_s6 + $0x10] sm:$0xff] %vm36_vm0, %v727_v35 }
 0x947   :  { %v720_v36 = vpop.f32.mrf.mxu3 }
 0x948   :  { %v721_v37 = vadd.f32 %v994_v38, %v720_v36 }
 0x94a   :  { %vm724_vm12 = vcmp.ge.f32.partialorder %v721_v37, 0.0  ;;  %v726_v39 = vmul.f32 0.01, %v721_v37 }
 0x94c   :  { %v728_v40 = vsel %vm724_vm12, %v721_v37, %v726_v39 }
 0x94d   :  { %730 = vst.msk [vmem:[%s1045_s6 + $0x18] sm:$0xff] %vm36_vm0, %v728_v40 }

</bundles_post_ra>
